<compile_context>
chip_gen: v7x
topology: tpu7x:2x2x1
jax: 0.10.0
libtpu: 0.0.40
codegen_flags: <defaults>
</compile_context>

<pallas_src>
from functools import partial

import jax
import jax.numpy as jnp
from jax.experimental import pallas as pl
from jax.experimental.pallas import tpu as pltpu

GAMMA = 1.1
ALPHA = 0.48
SMOOTH = 1.0
EPSILON = 1e-07

LANE = 128              # fast (lane) axis
SUBLANE = 8             # f32 sublane tile
MAX_BLOCK_ROWS = 1024   # (1024,128) f32 block = 512 KiB; fits all VMEM gens
N_CORES = 2             # leading "parallel" axis -> megacore sharding on v7x


def _round_up(x, m):
    return ((x + m - 1) // m) * m


def _fold8(x):
    """(R, LANE) -> (8, LANE) partial sum using plain vreg-wise VPU adds."""
    r, l = x.shape
    if r == SUBLANE:
        return x
    return jnp.sum(x.reshape(r // SUBLANE, SUBLANE, l), axis=0)


def _eml_kernel(yt_ref, yp_ref, acc_ref, *, n_valid, block_rows, steps_per_core):
    c = pl.program_id(0)          # per-"core" chunk (parallel axis)
    i = pl.program_id(1)          # reduction step within the chunk (arbitrary)

    @pl.when(i == 0)
    def _init():
        acc_ref[...] = jnp.zeros_like(acc_ref)

    yt = yt_ref[...].astype(jnp.float32)
    yp = yp_ref[...].astype(jnp.float32)

    # ---- dice partials (zero padding contributes exactly 0) ----
    inter = yt * yp
    s_tt = yt * yt
    s_pp = yp * yp

    # ---- fused focal partials: 2 logs + 1 exp per element ----
    #   y_true == 1:  alpha*(1-p)^g*log(p)   = exp(g*log(1-p)) * (alpha*log(p))
    #   y_true == 0:  (1-alpha)*p^g*log(1-p) = exp(g*log(p)) * ((1-a)*log(1-p))
    #   any other y_true contributes exactly 0 (matches the torch.where form).
    ypc = jnp.maximum(yp, EPSILON)          # torch.clamp(y_pred, epsilon)
    logp = jnp.log(ypc)
    log1m = jnp.log(1.0 - ypc)
    is1 = yt == 1.0
    arg = jnp.where(is1, GAMMA * log1m, GAMMA * logp)
    coef = jnp.where(is1, ALPHA * logp, (1.0 - ALPHA) * log1m)
    active = jnp.logical_or(is1, yt == 0.0)
    focal_term = jnp.exp(arg) * coef

    block_elems = block_rows * LANE
    base = (c * steps_per_core + i) * block_elems
    straddles = base + block_elems > n_valid    # block touches the padded tail?

    @pl.when(jnp.logical_not(straddles))
    def _fast():    # steady state: no masking work at all
        acc_ref[0] += _fold8(inter)
        acc_ref[1] += _fold8(s_tt)
        acc_ref[2] += _fold8(s_pp)
        acc_ref[3] += _fold8(jnp.where(active, focal_term, 0.0))

    @pl.when(straddles)
    def _tail():    # at most a couple of blocks per call take this path
        row_id = jax.lax.broadcasted_iota(jnp.int32, (block_rows, LANE), 0)
        col_id = jax.lax.broadcasted_iota(jnp.int32, (block_rows, LANE), 1)
        valid = (base + row_id * LANE + col_id) < n_valid
        maskf = valid.astype(jnp.float32)
        acc_ref[0] += _fold8(inter * maskf)
        acc_ref[1] += _fold8(s_tt * maskf)
        acc_ref[2] += _fold8(s_pp * maskf)
        acc_ref[3] += _fold8(
            jnp.where(jnp.logical_and(active, valid), focal_term, 0.0))


def eml_loss(y_pred, y_true, *, max_block_rows=MAX_BLOCK_ROWS, n_cores=N_CORES):
    """Pallas implementation of EMLLoss.forward (scalar float32)."""
    n = y_pred.size
    yp = jnp.ravel(y_pred)        # keep native dtype in HBM; kernel casts
    yt = jnp.ravel(y_true)

    rows = -(-n // LANE)
    block_rows = min(max_block_rows, _round_up(rows, SUBLANE))
    chunk_rows = n_cores * block_rows
    total_rows = _round_up(rows, chunk_rows)
    steps_per_core = total_rows // chunk_rows

    pad = total_rows * LANE - n
    if pad:                       # skip the copy entirely when already aligned
        yp = jnp.pad(yp, (0, pad))
        yt = jnp.pad(yt, (0, pad))
    yp2 = yp.reshape(total_rows, LANE)
    yt2 = yt.reshape(total_rows, LANE)

    in_map = lambda c, i: (c * steps_per_core + i, 0)

    partials = pl.pallas_call(
        partial(_eml_kernel, n_valid=n, block_rows=block_rows,
                steps_per_core=steps_per_core),
        out_shape=jax.ShapeDtypeStruct((n_cores * 4, SUBLANE, LANE), jnp.float32),
        grid_spec=pltpu.PrefetchScalarGridSpec(
            num_scalar_prefetch=0,
            grid=(n_cores, steps_per_core),
            in_specs=[pl.BlockSpec((block_rows, LANE), in_map),
                      pl.BlockSpec((block_rows, LANE), in_map)],
            out_specs=pl.BlockSpec((4, SUBLANE, LANE), lambda c, i: (c, 0, 0)),
        ),
        compiler_params=pltpu.CompilerParams(
            dimension_semantics=("parallel", "arbitrary"),
            vmem_limit_bytes=48 * 1024 * 1024,
        ),
    )(yt2, yp2)

    # Tiny final combine (4*8*128 numbers per core) + scalar loss math in JAX.
    sums = partials.reshape(n_cores, 4, -1).sum(axis=(0, 2))
    inter, s_tt, s_pp, s_focal = sums[0], sums[1], sums[2], sums[3]
    dice = (2.0 * inter + SMOOTH) / (s_tt + s_pp + SMOOTH)
    focal = -s_focal / jnp.float32(n)
    return focal - jnp.log(dice)


def eml_loss_ref(y_pred, y_true):
    """Pure-JAX reference mirroring the PyTorch forward exactly."""
    yt = jnp.ravel(y_true).astype(jnp.float32)
    yp = jnp.ravel(y_pred).astype(jnp.float32)
    inter = jnp.sum(yt * yp)
    dice = (2.0 * inter + SMOOTH) / (jnp.sum(yt * yt) + jnp.sum(yp * yp) + SMOOTH)
    ypc = jnp.maximum(yp, EPSILON)
    pt1 = jnp.where(yt == 1.0, ypc, jnp.ones_like(ypc))
    pt0 = jnp.where(yt == 0.0, ypc, jnp.zeros_like(ypc))
    focal = (-jnp.mean(ALPHA * jnp.power(1.0 - pt1, GAMMA) * jnp.log(pt1))
             - jnp.mean((1.0 - ALPHA) * jnp.power(pt0, GAMMA) * jnp.log(1.0 - pt0)))
    return focal - jnp.log(dice)


if __name__ == "__main__":
    key = jax.random.PRNGKey(0)
    k1, k2 = jax.random.split(key)

    # EMLLoss has no learnable parameters; only the two inputs are needed.
    shape = (2, 4, 16, 16)  # NCHW predictions / binary targets
    y_pred = jax.random.uniform(k1, shape, jnp.float32, minval=0.02, maxval=0.98)
    y_true = (jax.random.uniform(k2, shape, jnp.float32) > 0.5).astype(jnp.float32)

    out = jax.block_until_ready(eml_loss(y_pred, y_true))
    ref = eml_loss_ref(y_pred, y_true)
    assert jnp.allclose(out, ref, rtol=1e-4, atol=1e-5), (out, ref)

    # Non-tile-aligned shape: exercises the masked boundary-block path.
    k3, k4 = jax.random.split(k2)
    shape2 = (2, 3, 18, 18)
    y_pred2 = jax.random.uniform(k3, shape2, jnp.float32, minval=0.02, maxval=0.98)
    y_true2 = (jax.random.uniform(k4, shape2, jnp.float32) > 0.5).astype(jnp.float32)
    out2 = jax.block_until_ready(eml_loss(y_pred2, y_true2))
    ref2 = eml_loss_ref(y_pred2, y_true2)
    assert jnp.allclose(out2, ref2, rtol=1e-4, atol=1e-5), (out2, ref2)

    # Force steps_per_core > 1 to exercise multi-step accumulation.
    k5, k6 = jax.random.split(k4)
    shape3 = (2, 4, 16, 32)
    y_pred3 = jax.random.uniform(k5, shape3, jnp.float32, minval=0.02, maxval=0.98)
    y_true3 = (jax.random.uniform(k6, shape3, jnp.float32) > 0.5).astype(jnp.float32)
    out3 = jax.block_until_ready(eml_loss(y_pred3, y_true3, max_block_rows=8))
    ref3 = eml_loss_ref(y_pred3, y_true3)
    assert jnp.allclose(out3, ref3, rtol=1e-4, atol=1e-5), (out3, ref3)

    print("KERNEL_OK")
</pallas_src>

<mosaic_0001>
module attributes {stable_mosaic.version = 11 : i64} {
  func.func @_eml_kernel(%arg0: i32, %arg1: i32, %arg2: memref<16x128xf32, #tpu.memory_space<vmem>>, %arg3: memref<16x128xf32, #tpu.memory_space<vmem>>, %arg4: memref<4x8x128xf32, #tpu.memory_space<vmem>>) attributes {dimension_semantics = [#tpu.dimension_semantics<parallel>, #tpu.dimension_semantics<arbitrary>], iteration_bounds = array<i64: 2, 1>, scalar_prefetch = 0 : i64, scratch_operands = 0 : i64, tpu.core_type = #tpu.core_type<tc>, window_params = [{transform_indices = @transform_0, window_bounds = array<i64: 16, 128>}, {transform_indices = @transform_1, window_bounds = array<i64: 16, 128>}, {transform_indices = @transform_2, window_bounds = array<i64: 4, 8, 128>}]} {
    %c0_i32 = arith.constant 0 : i32
    %0 = arith.cmpi eq, %arg1, %c0_i32 : i32
    %1 = arith.extui %0 : i1 to i32
    %c0_i32_0 = arith.constant 0 : i32
    %2 = arith.cmpi ne, %1, %c0_i32_0 : i32
    scf.if %2 {
      %cst_15 = arith.constant 0.000000e+00 : f32
      %41 = vector.broadcast %cst_15 : f32 to vector<4x8x128xf32>
      %c0_16 = arith.constant 0 : index
      %c0_17 = arith.constant 0 : index
      %c0_18 = arith.constant 0 : index
      %42 = vector.load %arg4[%c0_16, %c0_17, %c0_18] : memref<4x8x128xf32, #tpu.memory_space<vmem>>, vector<4x8x128xf32>
      tpu.vector_store %arg4[%c0_16, %c0_17, %c0_18], %41 {strides = array<i32>} : memref<4x8x128xf32, #tpu.memory_space<vmem>>, vector<4x8x128xf32>,
    } else {
    }
    %c0 = arith.constant 0 : index
    %c0_1 = arith.constant 0 : index
    %3 = vector.load %arg2[%c0, %c0_1] : memref<16x128xf32, #tpu.memory_space<vmem>>, vector<16x128xf32>
    %c0_2 = arith.constant 0 : index
    %c0_3 = arith.constant 0 : index
    %4 = vector.load %arg3[%c0_2, %c0_3] : memref<16x128xf32, #tpu.memory_space<vmem>>, vector<16x128xf32>
    %5 = arith.mulf %3, %4 : vector<16x128xf32>
    %6 = arith.mulf %3, %3 : vector<16x128xf32>
    %7 = arith.mulf %4, %4 : vector<16x128xf32>
    %cst = arith.constant 1.000000e-07 : f32
    %8 = vector.broadcast %cst : f32 to vector<16x128xf32>
    %9 = arith.maximumf %4, %8 : vector<16x128xf32>
    %10 = math.log %9 : vector<16x128xf32>
    %cst_4 = arith.constant 1.000000e+00 : f32
    %11 = vector.broadcast %cst_4 : f32 to vector<16x128xf32>
    %12 = arith.subf %11, %9 : vector<16x128xf32>
    %13 = math.log %12 : vector<16x128xf32>
    %cst_5 = arith.constant 1.000000e+00 : f32
    %14 = vector.broadcast %cst_5 : f32 to vector<16x128xf32>
    %15 = arith.cmpf oeq, %3, %14 : vector<16x128xf32>
    %cst_6 = arith.constant 1.100000e+00 : f32
    %16 = vector.broadcast %cst_6 : f32 to vector<16x128xf32>
    %17 = arith.mulf %16, %13 : vector<16x128xf32>
    %cst_7 = arith.constant 1.100000e+00 : f32
    %18 = vector.broadcast %cst_7 : f32 to vector<16x128xf32>
    %19 = arith.mulf %18, %10 : vector<16x128xf32>
    %20 = arith.select %15, %17, %19 : vector<16x128xi1>, vector<16x128xf32>
    %cst_8 = arith.constant 4.800000e-01 : f32
    %21 = vector.broadcast %cst_8 : f32 to vector<16x128xf32>
    %22 = arith.mulf %21, %10 : vector<16x128xf32>
    %cst_9 = arith.constant 5.200000e-01 : f32
    %23 = vector.broadcast %cst_9 : f32 to vector<16x128xf32>
    %24 = arith.mulf %23, %13 : vector<16x128xf32>
    %25 = arith.select %15, %22, %24 : vector<16x128xi1>, vector<16x128xf32>
    %cst_10 = arith.constant 0.000000e+00 : f32
    %26 = vector.broadcast %cst_10 : f32 to vector<16x128xf32>
    %27 = arith.cmpf oeq, %3, %26 : vector<16x128xf32>
    %28 = arith.ori %15, %27 : vector<16x128xi1>
    %29 = math.exp %20 : vector<16x128xf32>
    %30 = arith.mulf %29, %25 : vector<16x128xf32>
    %c1_i32 = arith.constant 1 : i32
    %31 = arith.muli %arg0, %c1_i32 : i32
    %32 = arith.addi %31, %arg1 : i32
    %c2048_i32 = arith.constant 2048 : i32
    %33 = arith.muli %32, %c2048_i32 : i32
    %c2048_i32_11 = arith.constant 2048 : i32
    %34 = arith.addi %33, %c2048_i32_11 : i32
    %c2048_i32_12 = arith.constant 2048 : i32
    %35 = arith.cmpi sgt, %34, %c2048_i32_12 : i32
    %true = arith.constant true
    %36 = arith.xori %35, %true : i1
    %37 = arith.extui %36 : i1 to i32
    %c0_i32_13 = arith.constant 0 : i32
    %38 = arith.cmpi ne, %37, %c0_i32_13 : i32
    scf.if %38 {
      %c0_15 = arith.constant 0 : index
      %c0_16 = arith.constant 0 : index
      %c0_17 = arith.constant 0 : index
      %41 = vector.load %arg4[%c0_15, %c0_16, %c0_17] : memref<4x8x128xf32, #tpu.memory_space<vmem>>, vector<1x8x128xf32>
      %42 = vector.shape_cast %41 : vector<1x8x128xf32> to vector<8x128xf32>
      %43 = vector.shape_cast %5 : vector<16x128xf32> to vector<2x8x128xf32>
      %cst_18 = arith.constant dense<0.000000e+00> : vector<8x128xf32>
      %44 = vector.multi_reduction <add>, %43, %cst_18 [0] : vector<2x8x128xf32> to vector<8x128xf32>
      %45 = arith.addf %42, %44 : vector<8x128xf32>
      %c0_19 = arith.constant 0 : index
      %c0_20 = arith.constant 0 : index
      %c0_21 = arith.constant 0 : index
      %46 = vector.load %arg4[%c0_19, %c0_20, %c0_21] : memref<4x8x128xf32, #tpu.memory_space<vmem>>, vector<1x8x128xf32>
      %47 = vector.shape_cast %46 : vector<1x8x128xf32> to vector<8x128xf32>
      %48 = vector.shape_cast %45 : vector<8x128xf32> to vector<1x8x128xf32>
      tpu.vector_store %arg4[%c0_19, %c0_20, %c0_21], %48 {strides = array<i32>} : memref<4x8x128xf32, #tpu.memory_space<vmem>>, vector<1x8x128xf32>,
      %c1 = arith.constant 1 : index
      %c0_22 = arith.constant 0 : index
      %c0_23 = arith.constant 0 : index
      %49 = vector.load %arg4[%c1, %c0_22, %c0_23] : memref<4x8x128xf32, #tpu.memory_space<vmem>>, vector<1x8x128xf32>
      %50 = vector.shape_cast %49 : vector<1x8x128xf32> to vector<8x128xf32>
      %51 = vector.shape_cast %6 : vector<16x128xf32> to vector<2x8x128xf32>
      %cst_24 = arith.constant dense<0.000000e+00> : vector<8x128xf32>
      %52 = vector.multi_reduction <add>, %51, %cst_24 [0] : vector<2x8x128xf32> to vector<8x128xf32>
      %53 = arith.addf %50, %52 : vector<8x128xf32>
      %c1_25 = arith.constant 1 : index
      %c0_26 = arith.constant 0 : index
      %c0_27 = arith.constant 0 : index
      %54 = vector.load %arg4[%c1_25, %c0_26, %c0_27] : memref<4x8x128xf32, #tpu.memory_space<vmem>>, vector<1x8x128xf32>
      %55 = vector.shape_cast %54 : vector<1x8x128xf32> to vector<8x128xf32>
      %56 = vector.shape_cast %53 : vector<8x128xf32> to vector<1x8x128xf32>
      tpu.vector_store %arg4[%c1_25, %c0_26, %c0_27], %56 {strides = array<i32>} : memref<4x8x128xf32, #tpu.memory_space<vmem>>, vector<1x8x128xf32>,
      %c2 = arith.constant 2 : index
      %c0_28 = arith.constant 0 : index
      %c0_29 = arith.constant 0 : index
      %57 = vector.load %arg4[%c2, %c0_28, %c0_29] : memref<4x8x128xf32, #tpu.memory_space<vmem>>, vector<1x8x128xf32>
      %58 = vector.shape_cast %57 : vector<1x8x128xf32> to vector<8x128xf32>
      %59 = vector.shape_cast %7 : vector<16x128xf32> to vector<2x8x128xf32>
      %cst_30 = arith.constant dense<0.000000e+00> : vector<8x128xf32>
      %60 = vector.multi_reduction <add>, %59, %cst_30 [0] : vector<2x8x128xf32> to vector<8x128xf32>
      %61 = arith.addf %58, %60 : vector<8x128xf32>
      %c2_31 = arith.constant 2 : index
      %c0_32 = arith.constant 0 : index
      %c0_33 = arith.constant 0 : index
      %62 = vector.load %arg4[%c2_31, %c0_32, %c0_33] : memref<4x8x128xf32, #tpu.memory_space<vmem>>, vector<1x8x128xf32>
      %63 = vector.shape_cast %62 : vector<1x8x128xf32> to vector<8x128xf32>
      %64 = vector.shape_cast %61 : vector<8x128xf32> to vector<1x8x128xf32>
      tpu.vector_store %arg4[%c2_31, %c0_32, %c0_33], %64 {strides = array<i32>} : memref<4x8x128xf32, #tpu.memory_space<vmem>>, vector<1x8x128xf32>,
      %c3 = arith.constant 3 : index
      %c0_34 = arith.constant 0 : index
      %c0_35 = arith.constant 0 : index
      %65 = vector.load %arg4[%c3, %c0_34, %c0_35] : memref<4x8x128xf32, #tpu.memory_space<vmem>>, vector<1x8x128xf32>
      %66 = vector.shape_cast %65 : vector<1x8x128xf32> to vector<8x128xf32>
      %cst_36 = arith.constant 0.000000e+00 : f32
      %67 = vector.broadcast %cst_36 : f32 to vector<16x128xf32>
      %68 = arith.select %28, %30, %67 : vector<16x128xi1>, vector<16x128xf32>
      %69 = vector.shape_cast %68 : vector<16x128xf32> to vector<2x8x128xf32>
      %cst_37 = arith.constant dense<0.000000e+00> : vector<8x128xf32>
      %70 = vector.multi_reduction <add>, %69, %cst_37 [0] : vector<2x8x128xf32> to vector<8x128xf32>
      %71 = arith.addf %66, %70 : vector<8x128xf32>
      %c3_38 = arith.constant 3 : index
      %c0_39 = arith.constant 0 : index
      %c0_40 = arith.constant 0 : index
      %72 = vector.load %arg4[%c3_38, %c0_39, %c0_40] : memref<4x8x128xf32, #tpu.memory_space<vmem>>, vector<1x8x128xf32>
      %73 = vector.shape_cast %72 : vector<1x8x128xf32> to vector<8x128xf32>
      %74 = vector.shape_cast %71 : vector<8x128xf32> to vector<1x8x128xf32>
      tpu.vector_store %arg4[%c3_38, %c0_39, %c0_40], %74 {strides = array<i32>} : memref<4x8x128xf32, #tpu.memory_space<vmem>>, vector<1x8x128xf32>,
    } else {
    }
    %39 = arith.extui %35 : i1 to i32
    %c0_i32_14 = arith.constant 0 : i32
    %40 = arith.cmpi ne, %39, %c0_i32_14 : i32
    scf.if %40 {
      %41 = tpu.iota {dimensions = array<i32: 0>} : vector<16x128xi32>
      %42 = tpu.iota {dimensions = array<i32: 1>} : vector<16x128xi32>
      %c128_i32 = arith.constant 128 : i32
      %43 = vector.broadcast %c128_i32 : i32 to vector<16x128xi32>
      %44 = arith.muli %41, %43 : vector<16x128xi32>
      %45 = vector.broadcast %33 : i32 to vector<16x128xi32>
      %46 = arith.addi %45, %44 : vector<16x128xi32>
      %47 = arith.addi %46, %42 : vector<16x128xi32>
      %c2048_i32_15 = arith.constant 2048 : i32
      %48 = vector.broadcast %c2048_i32_15 : i32 to vector<16x128xi32>
      %49 = arith.cmpi slt, %47, %48 : vector<16x128xi32>
      %50 = arith.extui %49 : vector<16x128xi1> to vector<16x128xi32>
      %51 = arith.sitofp %50 : vector<16x128xi32> to vector<16x128xf32>
      %c0_16 = arith.constant 0 : index
      %c0_17 = arith.constant 0 : index
      %c0_18 = arith.constant 0 : index
      %52 = vector.load %arg4[%c0_16, %c0_17, %c0_18] : memref<4x8x128xf32, #tpu.memory_space<vmem>>, vector<1x8x128xf32>
      %53 = vector.shape_cast %52 : vector<1x8x128xf32> to vector<8x128xf32>
      %54 = arith.mulf %5, %51 : vector<16x128xf32>
      %55 = vector.shape_cast %54 : vector<16x128xf32> to vector<2x8x128xf32>
      %cst_19 = arith.constant dense<0.000000e+00> : vector<8x128xf32>
      %56 = vector.multi_reduction <add>, %55, %cst_19 [0] : vector<2x8x128xf32> to vector<8x128xf32>
      %57 = arith.addf %53, %56 : vector<8x128xf32>
      %c0_20 = arith.constant 0 : index
      %c0_21 = arith.constant 0 : index
      %c0_22 = arith.constant 0 : index
      %58 = vector.load %arg4[%c0_20, %c0_21, %c0_22] : memref<4x8x128xf32, #tpu.memory_space<vmem>>, vector<1x8x128xf32>
      %59 = vector.shape_cast %58 : vector<1x8x128xf32> to vector<8x128xf32>
      %60 = vector.shape_cast %57 : vector<8x128xf32> to vector<1x8x128xf32>
      tpu.vector_store %arg4[%c0_20, %c0_21, %c0_22], %60 {strides = array<i32>} : memref<4x8x128xf32, #tpu.memory_space<vmem>>, vector<1x8x128xf32>,
      %c1 = arith.constant 1 : index
      %c0_23 = arith.constant 0 : index
      %c0_24 = arith.constant 0 : index
      %61 = vector.load %arg4[%c1, %c0_23, %c0_24] : memref<4x8x128xf32, #tpu.memory_space<vmem>>, vector<1x8x128xf32>
      %62 = vector.shape_cast %61 : vector<1x8x128xf32> to vector<8x128xf32>
      %63 = arith.mulf %6, %51 : vector<16x128xf32>
      %64 = vector.shape_cast %63 : vector<16x128xf32> to vector<2x8x128xf32>
      %cst_25 = arith.constant dense<0.000000e+00> : vector<8x128xf32>
      %65 = vector.multi_reduction <add>, %64, %cst_25 [0] : vector<2x8x128xf32> to vector<8x128xf32>
      %66 = arith.addf %62, %65 : vector<8x128xf32>
      %c1_26 = arith.constant 1 : index
      %c0_27 = arith.constant 0 : index
      %c0_28 = arith.constant 0 : index
      %67 = vector.load %arg4[%c1_26, %c0_27, %c0_28] : memref<4x8x128xf32, #tpu.memory_space<vmem>>, vector<1x8x128xf32>
      %68 = vector.shape_cast %67 : vector<1x8x128xf32> to vector<8x128xf32>
      %69 = vector.shape_cast %66 : vector<8x128xf32> to vector<1x8x128xf32>
      tpu.vector_store %arg4[%c1_26, %c0_27, %c0_28], %69 {strides = array<i32>} : memref<4x8x128xf32, #tpu.memory_space<vmem>>, vector<1x8x128xf32>,
      %c2 = arith.constant 2 : index
      %c0_29 = arith.constant 0 : index
      %c0_30 = arith.constant 0 : index
      %70 = vector.load %arg4[%c2, %c0_29, %c0_30] : memref<4x8x128xf32, #tpu.memory_space<vmem>>, vector<1x8x128xf32>
      %71 = vector.shape_cast %70 : vector<1x8x128xf32> to vector<8x128xf32>
      %72 = arith.mulf %7, %51 : vector<16x128xf32>
      %73 = vector.shape_cast %72 : vector<16x128xf32> to vector<2x8x128xf32>
      %cst_31 = arith.constant dense<0.000000e+00> : vector<8x128xf32>
      %74 = vector.multi_reduction <add>, %73, %cst_31 [0] : vector<2x8x128xf32> to vector<8x128xf32>
      %75 = arith.addf %71, %74 : vector<8x128xf32>
      %c2_32 = arith.constant 2 : index
      %c0_33 = arith.constant 0 : index
      %c0_34 = arith.constant 0 : index
      %76 = vector.load %arg4[%c2_32, %c0_33, %c0_34] : memref<4x8x128xf32, #tpu.memory_space<vmem>>, vector<1x8x128xf32>
      %77 = vector.shape_cast %76 : vector<1x8x128xf32> to vector<8x128xf32>
      %78 = vector.shape_cast %75 : vector<8x128xf32> to vector<1x8x128xf32>
      tpu.vector_store %arg4[%c2_32, %c0_33, %c0_34], %78 {strides = array<i32>} : memref<4x8x128xf32, #tpu.memory_space<vmem>>, vector<1x8x128xf32>,
      %c3 = arith.constant 3 : index
      %c0_35 = arith.constant 0 : index
      %c0_36 = arith.constant 0 : index
      %79 = vector.load %arg4[%c3, %c0_35, %c0_36] : memref<4x8x128xf32, #tpu.memory_space<vmem>>, vector<1x8x128xf32>
      %80 = vector.shape_cast %79 : vector<1x8x128xf32> to vector<8x128xf32>
      %81 = arith.andi %28, %49 : vector<16x128xi1>
      %cst_37 = arith.constant 0.000000e+00 : f32
      %82 = vector.broadcast %cst_37 : f32 to vector<16x128xf32>
      %83 = arith.select %81, %30, %82 : vector<16x128xi1>, vector<16x128xf32>
      %84 = vector.shape_cast %83 : vector<16x128xf32> to vector<2x8x128xf32>
      %cst_38 = arith.constant dense<0.000000e+00> : vector<8x128xf32>
      %85 = vector.multi_reduction <add>, %84, %cst_38 [0] : vector<2x8x128xf32> to vector<8x128xf32>
      %86 = arith.addf %80, %85 : vector<8x128xf32>
      %c3_39 = arith.constant 3 : index
      %c0_40 = arith.constant 0 : index
      %c0_41 = arith.constant 0 : index
      %87 = vector.load %arg4[%c3_39, %c0_40, %c0_41] : memref<4x8x128xf32, #tpu.memory_space<vmem>>, vector<1x8x128xf32>
      %88 = vector.shape_cast %87 : vector<1x8x128xf32> to vector<8x128xf32>
      %89 = vector.shape_cast %86 : vector<8x128xf32> to vector<1x8x128xf32>
      tpu.vector_store %arg4[%c3_39, %c0_40, %c0_41], %89 {strides = array<i32>} : memref<4x8x128xf32, #tpu.memory_space<vmem>>, vector<1x8x128xf32>,
    } else {
    }
    return
  }
  func.func @transform_0(%arg0: i32, %arg1: i32) -> (i32, i32) {
    %c1_i32 = arith.constant 1 : i32
    %0 = arith.muli %arg0, %c1_i32 : i32
    %1 = arith.addi %0, %arg1 : i32
    %c0_i32 = arith.constant 0 : i32
    %c0_i32_0 = arith.constant 0 : i32
    return %1, %c0_i32 : i32, i32
  }
  func.func @transform_1(%arg0: i32, %arg1: i32) -> (i32, i32) {
    %c1_i32 = arith.constant 1 : i32
    %0 = arith.muli %arg0, %c1_i32 : i32
    %1 = arith.addi %0, %arg1 : i32
    %c0_i32 = arith.constant 0 : i32
    %c0_i32_0 = arith.constant 0 : i32
    return %1, %c0_i32 : i32, i32
  }
  func.func @transform_2(%arg0: i32, %arg1: i32) -> (i32, i32, i32) {
    %c0_i32 = arith.constant 0 : i32
    %c0_i32_0 = arith.constant 0 : i32
    %c0_i32_1 = arith.constant 0 : i32
    return %arg0, %c0_i32, %c0_i32_0 : i32, i32, i32
  }
}

</mosaic_0001>

<bundles_post_ra>
// kernel: tpu_custom_call.1
= control target key start
LH: loop header
LB: loop body
LE: loop exit
PB: predicated region body
PF: predicated region fallthrough
CT: control target
= control target key end

     0   :  { %7 = vsyncpa [#allocation3], 0  ;;  %s1095_s0 = inlined_call_operand.hbm [shape: f32[32,128], index: 0, kind: input, shape index: {}]   ;;  %s1096_s1 = inlined_call_operand.hbm [shape: f32[32,128], index: 1, kind: input, shape index: {}]   ;;  %s1097_s2 = inlined_call_operand.hbm [shape: f32[8,8,128], index: 2, kind: output, shape index: {}]  }
   0x1   :  { %9 = vsyncpa [#allocation3 + $0x1], 0 }
   0x2   :  { %10 = vsyncpa [#allocation6], 0 }
   0x3   :  { %12 = vsyncpa [#allocation6 + $0x1], 0 }
   0x4   :  { %13 = vsyncpa [#allocation4], 0 }
   0x5   :  { %15 = vsyncpa [#allocation4 + $0x1], 0  ;;  %s774_s9 = smov 0   ;;  %s776_s10 = smov 0  }
   0x6   :  { %s778_s11 = smov 0   ;;  %s780_s12 = smov 0  }
   0x7   :  { %s782_s13 = smov 0   ;;  %s784_s14 = smov 0  }
   0x8 LB: > { %s478_s15 = sadd.s32 4294967295, %s748_s14   ;;  %s479_s16 = sadd.s32 4294967294, %s748_s14   ;;  %s748_s14 = sphi %s784_s14, %s21_s14   ;;  %s744_s13 = sphi %s782_s13, %s1121_s13   ;;  %s740_s12 = sphi %s780_s12, %s1120_s12   ;;  %s736_s11 = sphi %s778_s11, %s1119_s11   ;;  %s732_s10 = sphi %s776_s10, %s1118_s10   ;;  %s728_s9 = sphi %s774_s9, %s1117_s9  }
   0x9   : > { %s33_s17 = sadd.s32 1, %s744_s13  ;;  %s42_s18 = sadd.s32 1, %s736_s11 }
   0xa   : > { %p35_p0 = scmp.ge.s32.totalorder %s33_s17, 2  ;;  %p49_p1 = scmp.ne.s32.totalorder %s736_s11, %s732_s10 }
   0xb   : > { %p50_p2 = scmp.eq.s32.totalorder %s748_s14, 0  ;;  %p55_p3 = scmp.ne.s32.totalorder %s732_s10, %s728_s9 }
   0xc   : > { %s1123_s17 = smov (%p35_p0, %s33_s17), 0  ;;  %p56_p5 = scmp.eq.s32.totalorder %s478_s15, 0 }
   0xd   : > { %p815_p4 = por %p50_p2, %p49_p1  ;;  %s39_s20 = ssub.s32 %s744_s13, %s1123_s17 }
   0xe   : > { %p107_p6 = scmp.eq.s32.totalorder %s478_s15, 1  ;;  %p40_p7 = scmp.eq.s32.totalorder %s39_s20, 0 }
   0xf   : > { %p821_p8 = por %p56_p5, %p55_p3  ;;  %p113_p10 = scmp.eq.s32.totalorder %s479_s16, 1 }
  0x10   : > { %p825_p9 = por %p107_p6, %p49_p1  ;;  %p534_p13 = scmp.lt.s32.totalorder %s748_s14, 2 }
  0x11   : > { %s1101_s21 = scalar_select %p821_p8, 1, 0 }
  0x12   : > { %s1102_s22 = scalar_select %p825_p9, 1, 0 }
  0x13   : > { %s830_s23 = scalar_select %p40_p7, %s736_s11, %s42_s18  }
  0x14   : > { %p832_p11 = por %p113_p10, %p55_p3  ;;  %s839_s25 = sand.u32 1, %s736_s11  }
  0x15   : > { %s482_s26 = sshll.u32 %s839_s25, 4  ;;  %s514_s27 = sshll.u32 %s744_s13, 8 }
  0x16   : > { %s1103_s24 = scalar_select %p832_p11, 1, 0 }
  0x17   : > { %s848_s30 = scalar_lea.hbm %s1095_s0, %s514_s27  ;;  %s137_s3 = scalar_lea.vmem [#allocation2], %s482_s26 }
  0x18   : > { %s145_s4 = sshll.u32 %s137_s3, 4  ;;  %p856_p0 = pnand %p534_p13, %p815_p4  ;;  %s852_s4 = int_to_ptr.vmem [resolvable:$true] %s145_s4 }
  0x19   : > { %s134_s6 = scalar_lea.sflag [#allocation3], %s839_s25  ;;  %s602_s7 = scalar_lea.hbm %s848_s30, 256 }
  0x1a   : > { %p603_p2 = scmp.ne.s32.totalorder %s848_s30, %s602_s7  ;;  %p604_p3 = pneg %p856_p0 }
  0x1b   : > { %s607_s16 = scalar_lea.hbm %s1095_s0, 512  ;;  %p608_p4 = scmp.lt.u32.totalorder %s848_s30, %s1095_s0 }
  0x1c   : > { %p605_p5 = pnand %p604_p3, %p603_p2  ;;  %p609_p7 = scmp.lt.u32.totalorder %s607_s16, %s602_s7 }
  0x1d   : > { %p611_p13 = scmp.lt.u32.totalorder %s602_s7, %s848_s30 }
  0x1e   : > { %p606_p6 = pneg %p605_p5  ;;  %p610_p10 = por %p609_p7, %p608_p4 }
  0x20   : > { %p612_p12 = por %p611_p13, %p610_p10 }
  0x22   : > { %p613_p1 = pnand %p612_p12, %p606_p6 }
  0x24   : > { %616 = shalt.err (!%p613_p1)
}
  0x25   : > { %s617_s20 = scalar_lea.vmem %s852_s4, 256  ;;  %s750_s28 = smov [#allocation2]  }
  0x26   : > { %p618_p2 = scmp.ne.s32.totalorder %s852_s4, %s617_s20  ;;  %s622_s29 = sshll.u32 %s750_s28, 4  ;;  %s623_s29 = int_to_ptr.vmem [resolvable:$false] %s622_s29 }
  0x27   : > { %s624_s3 = scalar_lea.vmem %s623_s29, 512  ;;  %p625_p9 = scmp.lt.s32.totalorder %s852_s4, %s623_s29 }
  0x28   : > { %p620_p5 = pnand %p618_p2, %p604_p3  ;;  %p626_p4 = scmp.lt.s32.totalorder %s624_s3, %s617_s20 }
  0x2a   : > { %p621_p11 = pneg %p620_p5  ;;  %p627_p7 = por %p626_p4, %p625_p9 }
  0x2c   : > { %p628_p10 = pnand %p627_p7, %p621_p11 }
  0x2e   : > { %631 = shalt.err (!%p628_p10)
}
  0x2f   : > { %s751_s7 = smov 128   ;;  %s752_s8 = smov 8  }
  0x30   : > { %526 = dma.hbm_to_vmem [thread:$0]  (!%p856_p0), %s848_s30, 256, %s852_s4, %s134_s6, %s751_s7, %s751_s7, %s752_s8  }
  0x31   : > { %p175_p9 = scmp.lt.s32.totalorder %s748_s14, 3  ;;  %s898_s18 = scalar_lea.hbm %s1096_s1, %s514_s27 }
  0x32   : > { %p1105_p11 = scmp.ge.s32.totalorder %s748_s14, 1  ;;  %s159_s20 = scalar_lea.vmem [#allocation5], %s482_s26 }
  0x33   : > { %s167_s28 = sshll.u32 %s159_s20, 4  ;;  %s156_s30 = scalar_lea.sflag [#allocation6], %s839_s25  ;;  %s908_s28 = int_to_ptr.vmem [resolvable:$true] %s167_s28 }
  0x34   : > { %p902_p12 = pnand %p1105_p11, %p175_p9  ;;  %s632_s4 = scalar_lea.hbm %s898_s18, 256 }
  0x35   : > { %p633_p1 = scmp.ne.s32.totalorder %s898_s18, %s632_s4  ;;  %s637_s29 = scalar_lea.hbm %s1096_s1, 512 }
  0x36   : > { %p638_p2 = scmp.lt.u32.totalorder %s898_s18, %s1096_s1  ;;  %p639_p5 = scmp.lt.u32.totalorder %s637_s29, %s632_s4 }
  0x37   : > { %p635_p6 = pnand %p633_p1, %p604_p3  ;;  %p641_p7 = scmp.lt.u32.totalorder %s632_s4, %s898_s18 }
  0x38   : > { %p640_p4 = por %p639_p5, %p638_p2 }
  0x39   : > { %p636_p13 = pneg %p635_p6 }
  0x3a   : > { %p642_p10 = por %p641_p7, %p640_p4 }
  0x3c   : > { %p643_p9 = pnand %p642_p10, %p636_p13 }
  0x3e   : > { %646 = shalt.err (!%p643_p9)
}
  0x3f   : > { %s647_s26 = scalar_lea.vmem %s908_s28, 256  ;;  %s753_s16 = smov [#allocation5]  }
  0x40   : > { %p648_p11 = scmp.ne.s32.totalorder %s908_s28, %s647_s26  ;;  %s652_s20 = sshll.u32 %s753_s16, 4  ;;  %s653_s20 = int_to_ptr.vmem [resolvable:$false] %s652_s20 }
  0x41   : > { %s654_s27 = scalar_lea.vmem %s653_s20, 512  ;;  %p655_p8 = scmp.lt.s32.totalorder %s908_s28, %s653_s20 }
  0x42   : > { %p650_p1 = pnand %p648_p11, %p604_p3  ;;  %p656_p2 = scmp.lt.s32.totalorder %s654_s27, %s647_s26 }
  0x44   : > { %p651_p6 = pneg %p650_p1  ;;  %p657_p5 = por %p656_p2, %p655_p8 }
  0x46   : > { %p658_p4 = pnand %p657_p5, %p651_p6 }
  0x48   : > { %661 = shalt.err (!%p658_p4)
}
  0x49   : > { %529 = dma.hbm_to_vmem [thread:$0]  (!%p856_p0), %s898_s18, 256, %s908_s28, %s156_s30, %s751_s7, %s751_s7, %s752_s8  }
  0x4a   : > { %179 = sbr.rel (%p902_p12) target bundleno = 177 (0xb1), region = 28  ;;  %s942_s4 = sand.u32 (!%p902_p12), 1, %s732_s10  }
  0x4b   : > { %s489_s6 = sshll.u32 (!%p902_p12), %s942_s4, 4  ;;  %s182_s29 = scalar_lea.sflag (!%p902_p12), [#allocation3], %s942_s4 }
  0x4c   : > { %s185_s5 = scalar_lea.vmem (!%p902_p12), [#allocation2], %s489_s6  ;;  %p1107_p8 = scmp.ne.s32.totalorder (!%p902_p12), %s1101_s21, 0 }
  0x51   : > { %715 = dma.done.wait (%p1107_p8), %s182_s29, 256  }
  0x52   : > { %717 = vsyncadd (%p1107_p8), %s182_s29, 4294967040  ;;  %s191_s25 = scalar_lea.sflag [#allocation6], %s942_s4  ;;  %s194_s7 = scalar_lea.vmem [#allocation5], %s489_s6 }
  0x53   : > { %719 = dma.done.wait (%p1107_p8), %s191_s25, 256  }
  0x54   : > { %721 = vsyncadd (%p1107_p8), %s191_s25, 4294967040  ;;  %s491_s8 = sshll.u32 %s942_s4, 5  ;;  %s492_s18 = sshll.u32 %s740_s12, 11  ;;  %v754_v0 = vmov 0.0   ;;  %v233_v1 = vld [vmem:[%s185_s5] sm:$0xff]  ;;  %v234_v2 = vld [vmem:[%s185_s5 + $0x8] sm:$0xff] }
  0x55   : > { %s959_s19 = sadd.s32 2048, %s492_s18  ;;  %s961_s28 = scalar_lea.vmem [#allocation7], %s491_s8  ;;  %v235_v3 = vld [vmem:[%s194_s7] sm:$0xff]  ;;  %v236_v4 = vld [vmem:[%s194_s7 + $0x8] sm:$0xff]  ;;  %v969_v6 = vmul.f32 %v233_v1, %v233_v1  ;;  %v971_v7 = vmul.f32 %v234_v2, %v234_v2  ;;  %vm255_vm0 = vcmp.eq.f32.partialorder %v233_v1, 1.0  ;;  %vm269_vm1 = vcmp.eq.f32.partialorder %v233_v1, 0.0 }
  0x56   : > { %229 = vst [vmem:[%s961_s28] sm:$0xff] %v754_v0  ;;  %230 = vst [vmem:[%s961_s28 + $0x8] sm:$0xff] %v754_v0  ;;  %v967_v5 = vmul.f32 %v235_v3, %v233_v1  ;;  %v973_v8 = vmul.f32 %v235_v3, %v235_v3  ;;  %v975_v9 = vmul.f32 %v236_v4, %v234_v2  ;;  %v243_v11 = vmax.f32 %v235_v3, 1e-07  ;;  %p493_p0 = scmp.gt.s32.totalorder %s959_s19, 2048 }
  0x57   : > { %231 = vst [vmem:[%s961_s28 + $0x10] sm:$0xff] %v754_v0  ;;  %232 = vst [vmem:[%s961_s28 + $0x18] sm:$0xff] %v754_v0  ;;  %v977_v10 = vmul.f32 %v236_v4, %v236_v4  ;;  %v244_v12 = vmax.f32 %v236_v4, 1e-07  ;;  %vm270_vm2 = vcmp.eq.f32.partialorder %v234_v2, 0.0  ;;  %vm256_vm3 = vcmp.eq.f32.partialorder %v234_v2, 1.0 }
  0x58   : > { %590 = vlog2.f32 %v243_v11  ;;  %v249_v13 = vsub.f32 1.0, %v243_v11  ;;  %vm980_vm4 = vmor %vm255_vm0, %vm269_vm1  ;;  %v288_v44 = vadd.f32 (!%p493_p0), %v975_v9, %v967_v5  ;;  %v293_v46 = vadd.f32 (!%p493_p0), %v971_v7, %v969_v6 }
  0x59   : > { %v250_v14 = vsub.f32 1.0, %v244_v12  ;;  %592 = vlog2.f32 %v244_v12  ;;  %vm985_vm5 = vmor %vm256_vm3, %vm270_vm2  ;;  %v298_v48 = vadd.f32 (!%p493_p0), %v977_v10, %v973_v8 }
  0x5a   : > { %594 = vlog2.f32 %v249_v13 }
  0x5b   : > { %596 = vlog2.f32 %v250_v14 }
  0x5d   : > { %v287_v43 = vld [vmem:[%s961_s28] sm:$0xff] (!%p493_p0)  ;;  %v494_v45 = vld [vmem:[%s961_s28 + $0x8] sm:$0xff] (!%p493_p0) }
  0x5e   : > { %v496_v47 = vld [vmem:[%s961_s28 + $0x10] sm:$0xff] (!%p493_p0)  ;;  %v498_v50 = vld [vmem:[%s961_s28 + $0x18] sm:$0xff] (!%p493_p0)  ;;  %v289_v52 = vadd.f32 (!%p493_p0), %v288_v44, %v287_v43  ;;  %v294_v53 = vadd.f32 (!%p493_p0), %v494_v45, %v293_v46 }
  0x5f   : > { %v299_v54 = vadd.f32 (!%p493_p0), %v496_v47, %v298_v48 }
  0x60   : > { %290 = vst [vmem:[%s961_s28] sm:$0xff] (!%p493_p0), %v289_v52  ;;  %495 = vst [vmem:[%s961_s28 + $0x8] sm:$0xff] (!%p493_p0), %v294_v53 }
  0x61   : > { %497 = vst [vmem:[%s961_s28 + $0x10] sm:$0xff] (!%p493_p0), %v299_v54 }
  0x62   : > { %v591_v17 = vpop.eup %590 }
  0x63   : > { %v593_v18 = vpop.eup %592  ;;  %v246_v19 = vmul.f32 0.6931472, %v591_v17 }
  0x64   : > { %v595_v20 = vpop.eup %594  ;;  %v248_v21 = vmul.f32 0.6931472, %v593_v18 }
  0x65   : > { %v597_v22 = vpop.eup %596  ;;  %v252_v23 = vmul.f32 0.6931472, %v595_v20  ;;  %v259_v24 = vmul.f32 1.1, %v246_v19  ;;  %v263_v33 = vmul.f32 0.48, %v246_v19 }
  0x66   : > { %v254_v25 = vmul.f32 0.6931472, %v597_v22  ;;  %v260_v26 = vmul.f32 1.1, %v248_v21  ;;  %v264_v35 = vmul.f32 0.48, %v248_v21 }
  0x67   : > { %v257_v27 = vmul.f32 1.1, %v252_v23  ;;  %v265_v34 = vmul.f32 0.52, %v252_v23 }
  0x68   : > { %v258_v28 = vmul.f32 1.1, %v254_v25  ;;  %v266_v36 = vmul.f32 0.52, %v254_v25 }
  0x69   : > { %v261_v29 = vsel %vm255_vm0, %v257_v27, %v259_v24  ;;  %v267_v37 = vsel %vm255_vm0, %v263_v33, %v265_v34 }
  0x6a   : > { %v262_v30 = vsel %vm256_vm3, %v258_v28, %v260_v26  ;;  %v273_v31 = vmul.f32 1.442695, %v261_v29  ;;  %v268_v38 = vsel %vm256_vm3, %v264_v35, %v266_v36 }
  0x6b   : > { %v275_v32 = vmul.f32 1.442695, %v262_v30 }
  0x6c   : > { %598 = vpow2.f32 %v273_v31 }
  0x6d   : > { %600 = vpow2.f32 %v275_v32 }
  0x72   : > { %286 = sbr.rel (%p493_p0) target bundleno = 128 (0x80), region = 44 }
  0x76   : > { %v599_v39 = vpop.eup %598 }
  0x77   : > { %v601_v40 = vpop.eup %600  ;;  %v277_v41 = vmul.f32 %v599_v39, %v267_v37 }
  0x78   : > { %v278_v42 = vmul.f32 %v601_v40, %v268_v38 }
  0x79   : > { %v303_v49 = vsel %vm980_vm4, %v277_v41, 0.0 }
  0x7a   : > { %v304_v51 = vsel %vm985_vm5, %v278_v42, 0.0 }
  0x7b   : > { %v305_v55 = vadd.f32 %v304_v51, %v303_v49 }
  0x7d   : > { %v306_v56 = vadd.f32 %v498_v50, %v305_v55 }
  0x7f   : > { %499 = vst [vmem:[%s961_s28 + $0x18] sm:$0xff] %v306_v56 }
  0x80 PF: > { %p500_p3 = scmp.le.s32.totalorder %s959_s19, 2048 }
  0x81   : > { %v311_v57 = vlaneseq (!%p500_p3)  ;;  %v318_v59 = vstv (!%p500_p3), %s492_s18  ;;  %v755_v4 = vmov (!%p500_p3), 0.0   ;;  %v503_v22 = vld [vmem:[%s961_s28 + $0x8] sm:$0xff] (!%p500_p3)  ;;  %v505_v23 = vld [vmem:[%s961_s28 + $0x10] sm:$0xff] (!%p500_p3) }
  0x82   : > { %310 = sbr.rel (%p500_p3) target bundleno = 151 (0x97), region = 48 }
  0x83   : > { %v312_v58 = vshrl.u32 (!%p500_p3), %v311_v57, 7  ;;  %v315_v61 = vand.u32 (!%p500_p3), 127, %v311_v57 }
  0x85   : > { %v313_v60 = vadd.s32 (!%p500_p3), 8, %v312_v58  ;;  %v316_v62 = vmul.u32 (!%p500_p3), 128, %v312_v58 }
  0x87   : > { %v317_v63 = vmul.u32 (!%p500_p3), 128, %v313_v60  ;;  %v319_v0 = vadd.s32 (!%p500_p3), %v318_v59, %v316_v62 }
  0x89   : > { %v320_v1 = vadd.s32 %v318_v59, %v317_v63  ;;  %v321_v2 = vadd.s32 %v319_v0, %v315_v61 }
  0x8b   : > { %v322_v3 = vadd.s32 %v320_v1, %v315_v61  ;;  %vm323_vm6 = vcmp.lt.s32.totalorder %v321_v2, 2048 }
  0x8c   : > { %v501_v11 = vsel %vm323_vm6, 1.0, %v755_v4  ;;  %vm1017_vm7 = vmand %vm980_vm4, %vm323_vm6 }
  0x8d   : > { %vm324_vm8 = vcmp.lt.s32.totalorder %v322_v3, 2048  ;;  %v330_v13 = vmul.f32 %v501_v11, %v967_v5  ;;  %v337_v14 = vmul.f32 %v501_v11, %v969_v6  ;;  %v344_v17 = vmul.f32 %v501_v11, %v973_v8  ;;  %v507_v5 = vld [vmem:[%s961_s28 + $0x18] sm:$0xff]  ;;  %v329_v8 = vld [vmem:[%s961_s28] sm:$0xff] }
  0x8e   : > { %v502_v18 = vsel %vm324_vm8, 1.0, %v755_v4  ;;  %vm352_vm9 = vmand %vm985_vm5, %vm324_vm8  ;;  %v353_v19 = vsel %vm1017_vm7, %v277_v41, 0.0 }
  0x8f   : > { %v331_v15 = vmul.f32 %v502_v18, %v975_v9  ;;  %v338_v20 = vmul.f32 %v502_v18, %v971_v7  ;;  %v345_v21 = vmul.f32 %v502_v18, %v977_v10  ;;  %v354_v6 = vsel %vm352_vm9, %v278_v42, 0.0 }
  0x90   : > { %v355_v16 = vadd.f32 %v354_v6, %v353_v19 }
  0x91   : > { %v332_v24 = vadd.f32 %v331_v15, %v330_v13  ;;  %v339_v25 = vadd.f32 %v338_v20, %v337_v14  ;;  %v346_v26 = vadd.f32 %v345_v21, %v344_v17 }
  0x92   : > { %v356_v27 = vadd.f32 %v507_v5, %v355_v16 }
  0x93   : > { %v333_v28 = vadd.f32 %v332_v24, %v329_v8  ;;  %v340_v9 = vadd.f32 %v503_v22, %v339_v25  ;;  %v347_v29 = vadd.f32 %v505_v23, %v346_v26 }
  0x94   : > { %508 = vst [vmem:[%s961_s28 + $0x18] sm:$0xff] %v356_v27 }
  0x95   : > { %334 = vst [vmem:[%s961_s28] sm:$0xff] %v333_v28  ;;  %504 = vst [vmem:[%s961_s28 + $0x8] sm:$0xff] %v340_v9 }
  0x96   : > { %506 = vst [vmem:[%s961_s28 + $0x10] sm:$0xff] %v347_v29 }
  0x97 PF: > { %s516_s21 = sshll.u32 %s740_s12, 9  ;;  %s372_s26 = sshll.u32 %s961_s28, 4  ;;  %s1046_s26 = int_to_ptr.vmem [resolvable:$true] %s372_s26 }
  0x98   : > { %s1043_s15 = scalar_lea.hbm %s1097_s2, %s516_s21  ;;  %s359_s16 = scalar_lea.sflag [#allocation4], %s942_s4 }
  0x99   : > { %s662_s20 = scalar_lea.vmem %s1046_s26, 512  ;;  %p1114_p13 = scmp.ne.s32.totalorder %s1102_s22, 0 }
  0x9a   : > { %p663_p12 = scmp.ne.s32.totalorder %s1046_s26, %s662_s20  ;;  %s756_s27 = smov [#allocation7]  }
  0x9b   : > { %s666_s6 = sshll.u32 %s756_s27, 4  ;;  %s667_s6 = int_to_ptr.vmem [resolvable:$false] %s666_s6 }
  0x9c   : > { %p664_p7 = pnand %p663_p12, %p1114_p13  ;;  %s668_s12 = scalar_lea.vmem %s667_s6, 1024 }
  0x9d   : > { %p669_p9 = scmp.lt.s32.totalorder %s1046_s26, %s667_s6  ;;  %p670_p11 = scmp.lt.s32.totalorder %s668_s12, %s662_s20 }
  0x9e   : > { %p665_p10 = pneg %p664_p7 }
  0x9f   : > { %p671_p1 = por %p670_p11, %p669_p9 }
  0xa1   : > { %p672_p6 = pnand %p671_p1, %p665_p10 }
  0xa3   : > { %675 = shalt.err (!%p672_p6)
}
  0xa4   : > { %s676_s29 = scalar_lea.hbm %s1043_s15, 512  ;;  %s680_s7 = scalar_lea.hbm %s1097_s2, 1024 }
  0xa5   : > { %p677_p2 = scmp.ne.s32.totalorder %s1043_s15, %s676_s29  ;;  %p681_p8 = scmp.lt.u32.totalorder %s1043_s15, %s1097_s2 }
  0xa6   : > { %p682_p0 = scmp.lt.u32.totalorder %s680_s7, %s676_s29  ;;  %p684_p12 = scmp.lt.u32.totalorder %s676_s29, %s1043_s15 }
  0xa7   : > { %p678_p5 = pnand %p677_p2, %p1114_p13 }
  0xa8   : > { %p683_p3 = por %p682_p0, %p681_p8 }
  0xa9   : > { %p679_p4 = pneg %p678_p5 }
  0xaa   : > { %p685_p7 = por %p684_p12, %p683_p3 }
  0xac   : > { %p686_p10 = pnand %p685_p7, %p679_p4 }
  0xae   : > { %689 = shalt.err (!%p686_p10)
}
  0xaf   : > { %s757_s19 = smov 128   ;;  %s758_s28 = smov 8  }
  0xb0   : > { %521 = dma.vmem_to_hbm [thread:$0]  (%p1114_p13), %s1046_s26, 512, %s1043_s15, %s359_s16, %s757_s19, %s757_s19, %s758_s28  }
  0xb1 PF: > { %s387_s21 = sand.u32 1, %s728_s9   ;;  %p1115_p9 = scmp.ne.s32.totalorder %s1103_s24, 0 }
  0xb2   : > { %p1116_p11 = scmp.ge.s32.totalorder %s748_s14, 2  ;;  %s388_s30 = scalar_lea.sflag [#allocation4], %s387_s21 }
  0xb4   : > { %p531_p1 = pnand %p1116_p11, %p1115_p9 }
  0xb6   : > { %723 = dma.done.wait (!%p531_p1), %s388_s30, 512  }
  0xb7   : > { %725 = vsyncadd (!%p531_p1), %s388_s30, 4294966784  ;;  %s21_s14 = sadd.s32 1, %s748_s14   ;;  %s1117_s9 = smov %s732_s10 }
  0xb8   : > { %p18_p6 = scmp.ge.s32.totalorder %s21_s14, 4   ;;  %s1118_s10 = smov %s736_s11 }
  0xb9   : > { %s1119_s11 = smov %s830_s23  ;;  %s1120_s12 = smov %s744_s13 }
  0xba   : > { %s1121_s13 = smov %s1123_s17  ;;  %20 = sbr.rel (!%p18_p6) target bundleno = 8 (0x8), region = 104 }
  0xc1   :  { %393 = vsyncpa [#allocation3], 1 }
  0xc2   :  { %395 = vsyncpa [#allocation3 + $0x1], 1 }
  0xc3   :  { %396 = vsyncpa [#allocation6], 1 }
  0xc4   :  { %398 = vsyncpa [#allocation6 + $0x1], 1 }
  0xc5   :  { %399 = vsyncpa [#allocation4], 1 }
  0xc6   :  { %401 = vsyncpa [#allocation4 + $0x1], 1 }

</bundles_post_ra>
